<compile_context>
chip_gen: v5e
topology: v5e:2x2
jax: 0.10.0
libtpu: 0.0.40
codegen_flags: <defaults>
</compile_context>

<pallas_src>
import functools
import math

import jax
import jax.numpy as jnp
from jax.experimental import pallas as pl
from jax.experimental.pallas import tpu as pltpu


def _moving_avg_kernel(x_ref, o_ref, *, kernel_size, pad_front, use_cumsum):
    """x_ref: (TR, L) rows of one block, time on lanes.
       o_ref: (TR, Lf) stride-1 sliding-window means, Lf = L + 2*pad_front - k + 1."""
    rows, L = x_ref.shape
    Lf = o_ref.shape[1]
    x = x_ref[...].astype(jnp.float32)

    # In-kernel edge replication (replaces the wrapper-side pad + concat).
    pieces = []
    if pad_front > 0:
        pieces.append(jnp.broadcast_to(x[:, :1], (rows, pad_front)))
    pieces.append(x)
    if pad_front > 0:
        pieces.append(jnp.broadcast_to(x[:, -1:], (rows, pad_front)))
    xp = jnp.concatenate(pieces, axis=1) if len(pieces) > 1 else x   # (rows, Lp)
    Lp = L + 2 * pad_front

    inv_k = 1.0 / kernel_size
    if use_cumsum:
        # Exclusive prefix sum S (length Lp+1) along lanes via Hillis-Steele.
        # Shifts are zero-concat + start-aligned slice (lowers to XLU lane shifts).
        n = Lp + 1
        s = jnp.concatenate([jnp.zeros((rows, 1), jnp.float32), xp], axis=1)
        d = 1
        while d < n:
            shifted = jnp.concatenate(
                [jnp.zeros((rows, d), jnp.float32), s[:, :n - d]], axis=1)
            s = s + shifted
            d *= 2
        # window_sum(i) = S[i + k] - S[i]  (two offset slices total).
        win = s[:, kernel_size:kernel_size + Lf] - s[:, 0:Lf]
    else:
        # Small k: direct k-tap shifted add along lanes.
        win = xp[:, 0:Lf]
        for j in range(1, kernel_size):
            win = win + xp[:, j:j + Lf]

    o_ref[...] = (win * inv_k).astype(o_ref.dtype)


def _round_up(a, m):
    return ((a + m - 1) // m) * m


def _choose_row_tile(R, L, Lf):
    """Pick row-tile TR: multiple of 8, ~1-2 MiB per step, >=2 grid steps when possible."""
    if R <= 8:
        return R
    target_bytes = 2 * 1024 * 1024
    bytes_per_row = (L + Lf) * 4
    tr = max(8, min(512, (target_bytes // max(bytes_per_row, 1)) // 8 * 8))
    # Keep at least 2 grid steps so both v7x TensorCores get work.
    tr = min(tr, _round_up((R + 1) // 2, 8))
    return max(8, tr)


def moving_avg(x, kernel_size, stride):
    """x: (B, L, C). Returns (B, Lo, C), Lo = (L + 2*pf - k)//stride + 1."""
    B, L, C = x.shape
    pf = (kernel_size - 1) // 2
    Lp = L + 2 * pf
    Lf = Lp - kernel_size + 1                         # stride-1 window count

    # Lane-dense presentation: time on the 128-lane axis, B*C rows on sublanes.
    xt = jnp.transpose(x, (0, 2, 1)).reshape(B * C, L)
    R = B * C
    TR = _choose_row_tile(R, L, Lf)

    # Prefix-sum path only pays off when k-1 direct taps exceed the scan depth.
    n_scan_steps = max(1, math.ceil(math.log2(Lp + 1)))
    use_cumsum = (kernel_size - 1) > n_scan_steps

    out = pl.pallas_call(
        functools.partial(
            _moving_avg_kernel,
            kernel_size=kernel_size,
            pad_front=pf,
            use_cumsum=use_cumsum,
        ),
        out_shape=jax.ShapeDtypeStruct((R, Lf), x.dtype),
        grid=(pl.cdiv(R, TR),),
        in_specs=[pl.BlockSpec((TR, L), lambda i: (i, 0))],
        out_specs=pl.BlockSpec((TR, Lf), lambda i: (i, 0)),
        compiler_params=pltpu.CompilerParams(
            dimension_semantics=("parallel",)),
    )(xt)

    out = out.reshape(B, C, Lf)
    if stride != 1:
        # TODO(synk): fold the stride into the in-kernel prefix-sum slices so
        # only every stride-th window is computed (DLinear always uses stride=1).
        out = out[:, :, ::stride]
    return jnp.transpose(out, (0, 2, 1))               # (B, Lo, C)


# ------------------------- pure-JAX reference (for checking) -------------------------
def reference_moving_avg(x, kernel_size, stride):
    B, L, C = x.shape
    pf = (kernel_size - 1) // 2
    front = jnp.repeat(x[:, :1, :], pf, axis=1)
    end = jnp.repeat(x[:, -1:, :], pf, axis=1)
    xp = jnp.concatenate([front, x, end], axis=1)
    s = jax.lax.reduce_window(
        xp, 0.0, jax.lax.add,
        window_dimensions=(1, kernel_size, 1),
        window_strides=(1, stride, 1),
        padding="VALID")
    return s / kernel_size


if __name__ == "__main__":
    key = jax.random.PRNGKey(0)
    k1, k2, k3 = jax.random.split(key, 3)

    # Config 1: DLinear default kernel (k=25, stride=1), ETT-like channel count.
    B1, L1, C1, K1, S1 = 2, 48, 7, 25, 1
    x1 = jax.random.normal(k1, (B1, L1, C1), jnp.float32)
    f1 = jax.jit(functools.partial(moving_avg, kernel_size=K1, stride=S1))
    out1 = jax.block_until_ready(f1(x1))
    ref1 = reference_moving_avg(x1, K1, S1)
    assert out1.shape == ref1.shape, (out1.shape, ref1.shape)
    assert bool(jnp.all(jnp.isfinite(out1)))
    assert jnp.allclose(out1, ref1, atol=1e-5, rtol=1e-5), \
        float(jnp.max(jnp.abs(out1 - ref1)))

    # Config 2: even kernel + stride > 1 (exercises the direct-tap path).
    B2, L2, C2, K2, S2 = 3, 24, 5, 4, 2
    x2 = jax.random.normal(k2, (B2, L2, C2), jnp.float32)
    f2 = jax.jit(functools.partial(moving_avg, kernel_size=K2, stride=S2))
    out2 = jax.block_until_ready(f2(x2))
    ref2 = reference_moving_avg(x2, K2, S2)
    assert out2.shape == ref2.shape, (out2.shape, ref2.shape)
    assert bool(jnp.all(jnp.isfinite(out2)))
    assert jnp.allclose(out2, ref2, atol=1e-5, rtol=1e-5), \
        float(jnp.max(jnp.abs(out2 - ref2)))

    # Config 3: small row count (B*C < 8) — single whole-array block.
    B3, L3, C3, K3, S3 = 1, 16, 4, 7, 1
    x3 = jax.random.normal(k3, (B3, L3, C3), jnp.float32)
    f3 = jax.jit(functools.partial(moving_avg, kernel_size=K3, stride=S3))
    out3 = jax.block_until_ready(f3(x3))
    ref3 = reference_moving_avg(x3, K3, S3)
    assert out3.shape == ref3.shape, (out3.shape, ref3.shape)
    assert bool(jnp.all(jnp.isfinite(out3)))
    assert jnp.allclose(out3, ref3, atol=1e-5, rtol=1e-5), \
        float(jnp.max(jnp.abs(out3 - ref3)))

    print("KERNEL_OK")
</pallas_src>

<mosaic_0001>
module attributes {stable_mosaic.version = 11 : i64} {
  func.func @_moving_avg_kernel(%arg0: i32, %arg1: memref<8x48xf32, #tpu.memory_space<vmem>>, %arg2: memref<8x48xf32, #tpu.memory_space<vmem>>) attributes {dimension_semantics = [#tpu.dimension_semantics<parallel>], iteration_bounds = array<i64: 2>, scalar_prefetch = 0 : i64, scratch_operands = 0 : i64, tpu.core_type = #tpu.core_type<tc>, window_params = [{transform_indices = @transform_0, window_bounds = array<i64: 8, 48>}, {transform_indices = @transform_1, window_bounds = array<i64: 8, 48>}]} {
    %c0 = arith.constant 0 : index
    %c0_0 = arith.constant 0 : index
    %0 = vector.load %arg1[%c0, %c0_0] : memref<8x48xf32, #tpu.memory_space<vmem>>, vector<8x48xf32>
    %1 = vector.extract_strided_slice %0 {offsets = [0, 0], sizes = [8, 1], strides = [1, 1]} : vector<8x48xf32> to vector<8x1xf32>
    %2 = vector.shape_cast %1 : vector<8x1xf32> to vector<8x1xf32>
    %3 = vector.broadcast %2 : vector<8x1xf32> to vector<8x12xf32>
    %4 = vector.extract_strided_slice %0 {offsets = [0, 47], sizes = [8, 1], strides = [1, 1]} : vector<8x48xf32> to vector<8x1xf32>
    %5 = vector.shape_cast %4 : vector<8x1xf32> to vector<8x1xf32>
    %6 = vector.broadcast %5 : vector<8x1xf32> to vector<8x12xf32>
    %7 = tpu.concatenate %3, %0, %6 in 1 : vector<8x12xf32>, vector<8x48xf32>, vector<8x12xf32> -> vector<8x72xf32>
    %cst = arith.constant 0.000000e+00 : f32
    %8 = vector.broadcast %cst : f32 to vector<8x1xf32>
    %9 = tpu.concatenate %8, %7 in 1 : vector<8x1xf32>, vector<8x72xf32> -> vector<8x73xf32>
    %cst_1 = arith.constant 0.000000e+00 : f32
    %10 = vector.broadcast %cst_1 : f32 to vector<8x1xf32>
    %11 = vector.extract_strided_slice %9 {offsets = [0, 0], sizes = [8, 72], strides = [1, 1]} : vector<8x73xf32> to vector<8x72xf32>
    %12 = tpu.concatenate %10, %11 in 1 : vector<8x1xf32>, vector<8x72xf32> -> vector<8x73xf32>
    %13 = arith.addf %9, %12 : vector<8x73xf32>
    %cst_2 = arith.constant 0.000000e+00 : f32
    %14 = vector.broadcast %cst_2 : f32 to vector<8x2xf32>
    %15 = vector.extract_strided_slice %13 {offsets = [0, 0], sizes = [8, 71], strides = [1, 1]} : vector<8x73xf32> to vector<8x71xf32>
    %16 = tpu.concatenate %14, %15 in 1 : vector<8x2xf32>, vector<8x71xf32> -> vector<8x73xf32>
    %17 = arith.addf %13, %16 : vector<8x73xf32>
    %cst_3 = arith.constant 0.000000e+00 : f32
    %18 = vector.broadcast %cst_3 : f32 to vector<8x4xf32>
    %19 = vector.extract_strided_slice %17 {offsets = [0, 0], sizes = [8, 69], strides = [1, 1]} : vector<8x73xf32> to vector<8x69xf32>
    %20 = tpu.concatenate %18, %19 in 1 : vector<8x4xf32>, vector<8x69xf32> -> vector<8x73xf32>
    %21 = arith.addf %17, %20 : vector<8x73xf32>
    %cst_4 = arith.constant 0.000000e+00 : f32
    %22 = vector.broadcast %cst_4 : f32 to vector<8x8xf32>
    %23 = vector.extract_strided_slice %21 {offsets = [0, 0], sizes = [8, 65], strides = [1, 1]} : vector<8x73xf32> to vector<8x65xf32>
    %24 = tpu.concatenate %22, %23 in 1 : vector<8x8xf32>, vector<8x65xf32> -> vector<8x73xf32>
    %25 = arith.addf %21, %24 : vector<8x73xf32>
    %cst_5 = arith.constant 0.000000e+00 : f32
    %26 = vector.broadcast %cst_5 : f32 to vector<8x16xf32>
    %27 = vector.extract_strided_slice %25 {offsets = [0, 0], sizes = [8, 57], strides = [1, 1]} : vector<8x73xf32> to vector<8x57xf32>
    %28 = tpu.concatenate %26, %27 in 1 : vector<8x16xf32>, vector<8x57xf32> -> vector<8x73xf32>
    %29 = arith.addf %25, %28 : vector<8x73xf32>
    %cst_6 = arith.constant 0.000000e+00 : f32
    %30 = vector.broadcast %cst_6 : f32 to vector<8x32xf32>
    %31 = vector.extract_strided_slice %29 {offsets = [0, 0], sizes = [8, 41], strides = [1, 1]} : vector<8x73xf32> to vector<8x41xf32>
    %32 = tpu.concatenate %30, %31 in 1 : vector<8x32xf32>, vector<8x41xf32> -> vector<8x73xf32>
    %33 = arith.addf %29, %32 : vector<8x73xf32>
    %cst_7 = arith.constant 0.000000e+00 : f32
    %34 = vector.broadcast %cst_7 : f32 to vector<8x64xf32>
    %35 = vector.extract_strided_slice %33 {offsets = [0, 0], sizes = [8, 9], strides = [1, 1]} : vector<8x73xf32> to vector<8x9xf32>
    %36 = tpu.concatenate %34, %35 in 1 : vector<8x64xf32>, vector<8x9xf32> -> vector<8x73xf32>
    %37 = arith.addf %33, %36 : vector<8x73xf32>
    %38 = vector.extract_strided_slice %37 {offsets = [0, 25], sizes = [8, 48], strides = [1, 1]} : vector<8x73xf32> to vector<8x48xf32>
    %39 = vector.extract_strided_slice %37 {offsets = [0, 0], sizes = [8, 48], strides = [1, 1]} : vector<8x73xf32> to vector<8x48xf32>
    %40 = arith.subf %38, %39 : vector<8x48xf32>
    %cst_8 = arith.constant 4.000000e-02 : f32
    %41 = vector.broadcast %cst_8 : f32 to vector<8x48xf32>
    %42 = arith.mulf %40, %41 : vector<8x48xf32>
    %c0_9 = arith.constant 0 : index
    %c0_10 = arith.constant 0 : index
    %43 = vector.load %arg2[%c0_9, %c0_10] : memref<8x48xf32, #tpu.memory_space<vmem>>, vector<8x48xf32>
    tpu.vector_store %arg2[%c0_9, %c0_10], %42 {strides = array<i32>} : memref<8x48xf32, #tpu.memory_space<vmem>>, vector<8x48xf32>,
    return
  }
  func.func @transform_0(%arg0: i32) -> (i32, i32) {
    %c0_i32 = arith.constant 0 : i32
    %c0_i32_0 = arith.constant 0 : i32
    return %arg0, %c0_i32 : i32, i32
  }
  func.func @transform_1(%arg0: i32) -> (i32, i32) {
    %c0_i32 = arith.constant 0 : i32
    %c0_i32_0 = arith.constant 0 : i32
    return %arg0, %c0_i32 : i32, i32
  }
}

</mosaic_0001>

<bundles_post_ra>
// kernel: moving_avg.1
= control target key start
LH: loop header
LB: loop body
LE: loop exit
PB: predicated region body
PF: predicated region fallthrough
CT: control target
= control target key end

     0   :  { %s310_s6 = smov 0   ;;  %s334_s0 = inlined_call_operand.vmem [shape: f32[14,48], index: 0, kind: input, shape index: {}]   ;;  %s335_s1 = inlined_call_operand.vmem [shape: f32[14,48], index: 1, kind: output, shape index: {}]  }
   0x1 LB: > { %s248_s7 = sadd.s32 4294967295, %s286_s6   ;;  %p252_p0 = scmp.ge.s32.totalorder %s286_s6, 1  ;;  %s286_s6 = sphi %s310_s6, %s11_s6  }
   0x2   : > { %p86_p1 = scmp.lt.s32.totalorder %s286_s6, 3 }
   0x4   : > { %p87_p2 = pnand %p252_p0, %p86_p1 }
   0x5   : > { %p104_p3 = scmp.lt.s32.totalorder (!%p87_p2), %s248_s7, 1  ;;  %s290_s12 = smov (!%p87_p2), 12  }
   0x6   : > { %90 = sbr.rel (%p87_p2) target bundleno = 1221 (0x4c5), region = 24  ;;  %s291_s13 = smov (!%p87_p2), 1  }
   0x7   : > { %s292_s14 = smov (!%p87_p2), 2   ;;  %s293_s15 = smov (!%p87_p2), 4  }
   0x8   : > { %s294_s16 = smov (!%p87_p2), 8   ;;  %s295_s17 = smov (!%p87_p2), 16  }
   0x9   : > { %s296_s18 = smov (!%p87_p2), 32   ;;  %s297_s19 = smov (!%p87_p2), 64  }
   0xa   : > { %s298_s20 = smov (!%p87_p2), 25   ;;  %s299_s21 = smov (!%p87_p2), 103  }
   0xb   : > { %v288_v0 = vmov 0   ;;  %v289_v1 = vmov 47   ;;  %s337_s7 = smov (!%p104_p3, %s248_s7), 1  ;;  %vm125_vm0 = vcmask 97280   ;;  %vm127_vm1 = vcmask 490496  }
   0xc   : > { %277 = vset.pattern.permute.xlu0 %v288_v0  ;;  %278 = vset.pattern.permute.xlu1 %v289_v1  ;;  %s253_s8 = sshll.u32 %s337_s7, 3  ;;  %vm133_vm2 = vcmask 7168   ;;  %vm145_vm3 = vcmask 15360   ;;  %vm152_vm4 = vcmask 31744   ;;  %vm159_vm5 = vcmask 64512  }
   0xd   : > { %s107_s11 = scalar_lea.vmem %s334_s0, %s253_s8  ;;  %vm166_vm6 = vcmask 130048   ;;  %vm173_vm7 = vcmask 261120   ;;  %vm180_vm8 = vcmask 523264   ;;  %s111_s24 = scalar_lea.vmem %s335_s1, %s253_s8  ;;  %vm193_vm9 = vcmask 392192  }
   0xe   : > { %v112_v2 = vld [vmem:[%s107_s11] sm:$0xff] }
   0xf   : > { %115 = vperm.xlu0 %277, %v112_v2   ;;  %119 = vperm.xlu1 %278, %v112_v2  }
  0x17   : > { %122 = vrot.lane.b32.xlu0 %v112_v2, %s290_s12 }
  0x18   : > { %279 = vset.pattern.permute.xlu0 %v289_v1 }
  0x81   : > { %v116_v3 = vpop.permute.xlu0 %115  ;;  %v120_v4 = vpop.permute.xlu1 %119 }
  0x89   : > { %v123_v5 = vpop.permute.xlu0 %122 }
  0x8a   : > { %v126_v6 = vsel %vm125_vm0, %v116_v3, %v123_v5 }
  0x8b   : > { %v128_v7 = vsel %vm127_vm1, %v126_v6, %v120_v4 }
  0x8c   : > { %130 = vrot.lane.b32.xlu1 %v128_v7, %s291_s13 }
  0xfe   : > { %v131_v8 = vpop.permute.xlu1 %130 }
  0xff   : > { %v134_v9 = vsel %vm133_vm2, 0.0, %v131_v8 }
 0x100   : > { %136 = vrot.lane.b32.xlu2 %v134_v9, %s291_s13 }
 0x15a   : > { %v137_v10 = vpop.permute.xlu2 %136 }
 0x15b   : > { %v139_v11 = vsel %vm133_vm2, 0.0, %v137_v10 }
 0x15c   : > { %v140_v12 = vadd.f32 %v139_v11, %v134_v9 }
 0x15e   : > { %142 = vrot.lane.b32.xlu2 %v140_v12, %s292_s14 }
 0x1b8   : > { %v143_v13 = vpop.permute.xlu2 %142 }
 0x1b9   : > { %v146_v14 = vsel %vm145_vm3, 0.0, %v143_v13 }
 0x1ba   : > { %v147_v15 = vadd.f32 %v146_v14, %v140_v12 }
 0x1bc   : > { %149 = vrot.lane.b32.xlu0 %v147_v15, %s293_s15 }
 0x22e   : > { %v150_v16 = vpop.permute.xlu0 %149 }
 0x22f   : > { %v153_v17 = vsel %vm152_vm4, 0.0, %v150_v16 }
 0x230   : > { %v154_v18 = vadd.f32 %v153_v17, %v147_v15 }
 0x232   : > { %156 = vrot.lane.b32.xlu1 %v154_v18, %s294_s16 }
 0x2a4   : > { %v157_v19 = vpop.permute.xlu1 %156 }
 0x2a5   : > { %v160_v20 = vsel %vm159_vm5, 0.0, %v157_v19 }
 0x2a6   : > { %v161_v21 = vadd.f32 %v160_v20, %v154_v18 }
 0x2a8   : > { %163 = vrot.lane.b32.xlu2 %v161_v21, %s295_s17 }
 0x302   : > { %v164_v22 = vpop.permute.xlu2 %163 }
 0x303   : > { %v167_v23 = vsel %vm166_vm6, 0.0, %v164_v22 }
 0x304   : > { %v168_v24 = vadd.f32 %v167_v23, %v161_v21 }
 0x306   : > { %170 = vrot.lane.b32.xlu0 %v168_v24, %s296_s18 }
 0x378   : > { %v171_v25 = vpop.permute.xlu0 %170 }
 0x379   : > { %v174_v26 = vsel %vm173_vm7, 0.0, %v171_v25 }
 0x37a   : > { %v175_v27 = vadd.f32 %v174_v26, %v168_v24 }
 0x37c   : > { %177 = vrot.lane.b32.xlu1 %v175_v27, %s297_s19 }
 0x3ee   : > { %v178_v28 = vpop.permute.xlu1 %177 }
 0x3ef   : > { %v181_v29 = vsel %vm180_vm8, 0.0, %v178_v28 }
 0x3f0   : > { %v182_v30 = vadd.f32 %v181_v29, %v175_v27 }
 0x3f2   : > { %184 = vrot.lane.b32.xlu2 %v182_v30, %s298_s20 }
 0x44c   : > { %v185_v31 = vpop.permute.xlu2 %184 }
 0x44d   : > { %v187_v32 = vsub.f32 %v182_v30, %v185_v31 }
 0x44f   : > { %v188_v33 = vmul.f32 0.04, %v187_v32 }
 0x451   : > { %190 = vrot.lane.b32.xlu0 %v188_v33, %s299_s21 }
 0x4c3   : > { %v191_v34 = vpop.permute.xlu0 %190 }
 0x4c4   : > { %194 = vst.msk [vmem:[%s111_s24] sm:$0xff] %vm193_vm9, %v191_v34 }
 0x4c5 PF: > { %s11_s6 = sadd.s32 1, %s286_s6  }
 0x4c6   : > { %p8_p4 = scmp.ge.s32.totalorder %s11_s6, 4  }
 0x4c8   :  { %10 = sbr.rel (!%p8_p4) target bundleno = 1 (0x1), region = 54 }

</bundles_post_ra>
